<compile_context>
chip_gen: v6e
topology: v6e:2x2x1
jax: 0.10.0
libtpu: 0.0.40
codegen_flags: <defaults>
</compile_context>

<pallas_src>
import jax
import jax.numpy as jnp
from jax.experimental import pallas as pl
from jax.experimental.pallas import tpu as pltpu

LN_EPS = 1e-5          # PyTorch nn.LayerNorm default
FPAD = 128             # lane-dense padded width for every layer
DEFAULT_TILE_B = 1024  # batch tile (multiple of 8); safe on all chips


def _round_up(x, m):
    return ((x + m - 1) // m) * m


def _make_fused_kernel(features, in_dim, fpad):
    """Fused critic kernel for a fixed `features` config (static Python loop).

    Refs:
      x_ref : (TILE_B, in_dim)          input activation tile
      w_ref : (L+1, fpad, fpad)         stacked weights (layer L = value head)
      p_ref : (L+1, 3, fpad)            rows = [bias, gamma, beta] per layer
      o_ref : (TILE_B, 1)               value output tile
    """
    num_layers = len(features)

    def kernel(x_ref, w_ref, p_ref, o_ref):
        x = x_ref[...]
        in_f = in_dim
        for i, feat in enumerate(features):
            # Static slice: first layer only uses the real in_dim rows.
            w = w_ref[i] if in_f == fpad else w_ref[i, 0:in_f, :]
            y = jnp.dot(x, w, preferred_element_type=jnp.float32)
            y = y + p_ref[i, 0:1, :]                    # bias (0 on padded lanes)

            # LayerNorm over the real `feat` lanes.  Padded lanes of y are
            # exactly 0, so whole-row sums equal sums over the real lanes.
            inv_n = 1.0 / float(feat)
            mean = jnp.sum(y, axis=-1, keepdims=True) * inv_n
            ex2 = jnp.sum(y * y, axis=-1, keepdims=True) * inv_n
            var = ex2 - mean * mean                     # biased var, like PyTorch
            y = (y - mean) * jax.lax.rsqrt(var + LN_EPS)
            # gamma is 0 on padded lanes -> re-zeroes padding; beta padded = 0.
            y = y * p_ref[i, 1:2, :] + p_ref[i, 2:3, :]
            x = jnp.maximum(y, 0.0)                     # ReLU
            in_f = fpad

        # Value head (stored as layer `num_layers`); matmul stays lane-dense,
        # only column 0 is meaningful and only column 0 is written back.
        y = jnp.dot(x, w_ref[num_layers], preferred_element_type=jnp.float32)
        y = y + p_ref[num_layers, 0:1, :]
        o_ref[...] = y[:, 0:1].astype(o_ref.dtype)

    return kernel


def init_critic_params(key, features):
    """Torch-style params: list of (w, b, gamma, beta) per layer + (vw, vb) head.

    Matches the PyTorch module's shapes: layer i maps
    (features[i-1] if i > 0 else features[0]) -> features[i]; head maps
    features[-1] -> 1.
    """
    layer_params = []
    in_f = features[0]
    for feat in features:
        key, kw, kb = jax.random.split(key, 3)
        bound = 1.0 / float(in_f) ** 0.5
        w = jax.random.uniform(kw, (in_f, feat), jnp.float32, -bound, bound)
        b = jax.random.uniform(kb, (feat,), jnp.float32, -bound, bound)
        gamma = jnp.ones((feat,), jnp.float32)
        beta = jnp.zeros((feat,), jnp.float32)
        layer_params.append((w, b, gamma, beta))
        in_f = feat

    key, kw, kb = jax.random.split(key, 3)
    bound = 1.0 / float(in_f) ** 0.5
    vw = jax.random.uniform(kw, (in_f, 1), jnp.float32, -bound, bound)
    vb = jax.random.uniform(kb, (1,), jnp.float32, -bound, bound)
    return layer_params, (vw, vb)


def pack_params(layer_params, head_params, fpad=FPAD):
    """Stack all layer params (and the head) into 2 zero-padded buffers."""
    L = len(layer_params)
    w_all = jnp.zeros((L + 1, fpad, fpad), jnp.float32)
    p_all = jnp.zeros((L + 1, 3, fpad), jnp.float32)
    for i, (w, b, gamma, beta) in enumerate(layer_params):
        in_f, feat = w.shape
        w_all = w_all.at[i, :in_f, :feat].set(w)
        p_all = p_all.at[i, 0, :feat].set(b)
        p_all = p_all.at[i, 1, :feat].set(gamma)
        p_all = p_all.at[i, 2, :feat].set(beta)
    vw, vb = head_params
    w_all = w_all.at[L, : vw.shape[0], :1].set(vw)
    p_all = p_all.at[L, 0, :1].set(vb)
    return w_all, p_all


def critic_forward(x, w_all, p_all, features, tile_b=DEFAULT_TILE_B):
    """Fused forward pass: one pallas_call, batch-tiled grid."""
    B, in_dim = x.shape
    num_layers = len(features)
    fpad = w_all.shape[-1]

    tile_b = max(8, min(tile_b, _round_up(B, 8)))   # multiple of 8 (f32 sublanes)
    Bp = _round_up(B, tile_b)
    if Bp != B:
        # Zero rows normalize to zero (var=0 -> rsqrt(eps) * 0) -> no NaNs;
        # they are sliced off below.
        x = jnp.pad(x, ((0, Bp - B), (0, 0)))

    out = pl.pallas_call(
        _make_fused_kernel(features, in_dim, fpad),
        out_shape=jax.ShapeDtypeStruct((Bp, 1), jnp.float32),
        grid=(Bp // tile_b,),
        in_specs=[
            pl.BlockSpec((tile_b, in_dim), lambda i: (i, 0)),
            # Constant block index -> weights stay VMEM-resident across steps.
            pl.BlockSpec((num_layers + 1, fpad, fpad), lambda i: (0, 0, 0)),
            pl.BlockSpec((num_layers + 1, 3, fpad), lambda i: (0, 0, 0)),
        ],
        out_specs=pl.BlockSpec((tile_b, 1), lambda i: (i, 0)),
        compiler_params=pltpu.CompilerParams(
            dimension_semantics=("parallel",),
        ),
    )(x, w_all, p_all)
    return out[:B]


def critic_forward_ref(x, layer_params, head_params):
    """Pure-JAX reference (highest matmul precision, PyTorch LN semantics)."""
    for (w, b, gamma, beta) in layer_params:
        y = jnp.dot(x, w, precision=jax.lax.Precision.HIGHEST) + b
        mean = jnp.mean(y, axis=-1, keepdims=True)
        var = jnp.mean((y - mean) ** 2, axis=-1, keepdims=True)
        y = (y - mean) * jax.lax.rsqrt(var + LN_EPS) * gamma + beta
        x = jnp.maximum(y, 0.0)
    vw, vb = head_params
    return jnp.dot(x, vw, precision=jax.lax.Precision.HIGHEST) + vb


if __name__ == "__main__":
    features = [32, 64, 32]   # first entry is also the observation/input dim
    batch = 8

    key = jax.random.PRNGKey(0)
    key, kx, kp = jax.random.split(key, 3)
    x = jax.random.normal(kx, (batch, features[0]), jnp.float32)

    layer_params, head_params = init_critic_params(kp, features)
    w_all, p_all = pack_params(layer_params, head_params, FPAD)

    out = critic_forward(x, w_all, p_all, features)
    out = jax.block_until_ready(out)

    ref = critic_forward_ref(x, layer_params, head_params)
    assert out.shape == (batch, 1), out.shape
    max_err = float(jnp.max(jnp.abs(out - ref)))
    assert jnp.allclose(out, ref, atol=5e-4, rtol=5e-4), f"max abs err {max_err}"
    print("KERNEL_OK")
</pallas_src>

<mosaic_0001>
module attributes {stable_mosaic.version = 11 : i64} {
  func.func @kernel(%arg0: i32, %arg1: memref<8x32xf32, #tpu.memory_space<vmem>>, %arg2: memref<4x128x128xf32, #tpu.memory_space<vmem>>, %arg3: memref<4x3x128xf32, #tpu.memory_space<vmem>>, %arg4: memref<8x1xf32, #tpu.memory_space<vmem>>) attributes {dimension_semantics = [#tpu.dimension_semantics<parallel>], iteration_bounds = array<i64: 1>, scalar_prefetch = 0 : i64, scratch_operands = 0 : i64, tpu.core_type = #tpu.core_type<tc>, window_params = [{transform_indices = @transform_0, window_bounds = array<i64: 8, 32>}, {pipeline_mode = #tpu.pipeline_mode<synchronous>, transform_indices = @transform_1, window_bounds = array<i64: 4, 128, 128>}, {pipeline_mode = #tpu.pipeline_mode<synchronous>, transform_indices = @transform_2, window_bounds = array<i64: 4, 3, 128>}, {transform_indices = @transform_3, window_bounds = array<i64: 8, 1>}]} {
    %c0 = arith.constant 0 : index
    %c0_0 = arith.constant 0 : index
    %0 = vector.load %arg1[%c0, %c0_0] : memref<8x32xf32, #tpu.memory_space<vmem>>, vector<8x32xf32>
    %c0_1 = arith.constant 0 : index
    %c0_2 = arith.constant 0 : index
    %c0_3 = arith.constant 0 : index
    %1 = vector.load %arg2[%c0_1, %c0_2, %c0_3] : memref<4x128x128xf32, #tpu.memory_space<vmem>>, vector<1x32x128xf32>
    %2 = vector.shape_cast %1 : vector<1x32x128xf32> to vector<32x128xf32>
    %cst = arith.constant dense<0.000000e+00> : vector<8x128xf32>
    %3 = tpu.matmul %0, %2, %cst {dimension_numbers = #tpu.dot_dimension_numbers<[1], [0], [0], [1], [0, 0, 1, 1], [], []>} : vector<8x32xf32>, vector<32x128xf32>, vector<8x128xf32> -> vector<8x128xf32>
    %c0_4 = arith.constant 0 : index
    %c0_5 = arith.constant 0 : index
    %c0_6 = arith.constant 0 : index
    %4 = vector.load %arg3[%c0_4, %c0_5, %c0_6] : memref<4x3x128xf32, #tpu.memory_space<vmem>>, vector<1x1x128xf32>
    %5 = vector.shape_cast %4 : vector<1x1x128xf32> to vector<1x128xf32>
    %6 = vector.broadcast %5 : vector<1x128xf32> to vector<8x128xf32>
    %7 = arith.addf %3, %6 : vector<8x128xf32>
    %cst_7 = arith.constant dense<0.000000e+00> : vector<8xf32>
    %8 = vector.multi_reduction <add>, %7, %cst_7 [1] : vector<8x128xf32> to vector<8xf32>
    %9 = vector.shape_cast %8 : vector<8xf32> to vector<8x1xf32>
    %cst_8 = arith.constant 3.125000e-02 : f32
    %10 = vector.broadcast %cst_8 : f32 to vector<8x1xf32>
    %11 = arith.mulf %9, %10 : vector<8x1xf32>
    %12 = arith.mulf %7, %7 : vector<8x128xf32>
    %cst_9 = arith.constant dense<0.000000e+00> : vector<8xf32>
    %13 = vector.multi_reduction <add>, %12, %cst_9 [1] : vector<8x128xf32> to vector<8xf32>
    %14 = vector.shape_cast %13 : vector<8xf32> to vector<8x1xf32>
    %cst_10 = arith.constant 3.125000e-02 : f32
    %15 = vector.broadcast %cst_10 : f32 to vector<8x1xf32>
    %16 = arith.mulf %14, %15 : vector<8x1xf32>
    %17 = arith.mulf %11, %11 : vector<8x1xf32>
    %18 = arith.subf %16, %17 : vector<8x1xf32>
    %19 = vector.broadcast %11 : vector<8x1xf32> to vector<8x128xf32>
    %20 = arith.subf %7, %19 : vector<8x128xf32>
    %cst_11 = arith.constant 9.99999974E-6 : f32
    %21 = vector.broadcast %cst_11 : f32 to vector<8x1xf32>
    %22 = arith.addf %18, %21 : vector<8x1xf32>
    %23 = math.rsqrt %22 : vector<8x1xf32>
    %24 = vector.broadcast %23 : vector<8x1xf32> to vector<8x128xf32>
    %25 = arith.mulf %20, %24 : vector<8x128xf32>
    %c0_12 = arith.constant 0 : index
    %c1 = arith.constant 1 : index
    %c0_13 = arith.constant 0 : index
    %26 = vector.load %arg3[%c0_12, %c1, %c0_13] : memref<4x3x128xf32, #tpu.memory_space<vmem>>, vector<1x1x128xf32>
    %27 = vector.shape_cast %26 : vector<1x1x128xf32> to vector<1x128xf32>
    %28 = vector.broadcast %27 : vector<1x128xf32> to vector<8x128xf32>
    %29 = arith.mulf %25, %28 : vector<8x128xf32>
    %c0_14 = arith.constant 0 : index
    %c2 = arith.constant 2 : index
    %c0_15 = arith.constant 0 : index
    %30 = vector.load %arg3[%c0_14, %c2, %c0_15] : memref<4x3x128xf32, #tpu.memory_space<vmem>>, vector<1x1x128xf32>
    %31 = vector.shape_cast %30 : vector<1x1x128xf32> to vector<1x128xf32>
    %32 = vector.broadcast %31 : vector<1x128xf32> to vector<8x128xf32>
    %33 = arith.addf %29, %32 : vector<8x128xf32>
    %cst_16 = arith.constant 0.000000e+00 : f32
    %34 = vector.broadcast %cst_16 : f32 to vector<8x128xf32>
    %35 = arith.maximumf %33, %34 : vector<8x128xf32>
    %c1_17 = arith.constant 1 : index
    %c0_18 = arith.constant 0 : index
    %c0_19 = arith.constant 0 : index
    %36 = vector.load %arg2[%c1_17, %c0_18, %c0_19] : memref<4x128x128xf32, #tpu.memory_space<vmem>>, vector<1x128x128xf32>
    %37 = vector.shape_cast %36 : vector<1x128x128xf32> to vector<128x128xf32>
    %cst_20 = arith.constant dense<0.000000e+00> : vector<8x128xf32>
    %38 = tpu.matmul %35, %37, %cst_20 {dimension_numbers = #tpu.dot_dimension_numbers<[1], [0], [0], [1], [0, 0, 1, 1], [], []>} : vector<8x128xf32>, vector<128x128xf32>, vector<8x128xf32> -> vector<8x128xf32>
    %c1_21 = arith.constant 1 : index
    %c0_22 = arith.constant 0 : index
    %c0_23 = arith.constant 0 : index
    %39 = vector.load %arg3[%c1_21, %c0_22, %c0_23] : memref<4x3x128xf32, #tpu.memory_space<vmem>>, vector<1x1x128xf32>
    %40 = vector.shape_cast %39 : vector<1x1x128xf32> to vector<1x128xf32>
    %41 = vector.broadcast %40 : vector<1x128xf32> to vector<8x128xf32>
    %42 = arith.addf %38, %41 : vector<8x128xf32>
    %cst_24 = arith.constant dense<0.000000e+00> : vector<8xf32>
    %43 = vector.multi_reduction <add>, %42, %cst_24 [1] : vector<8x128xf32> to vector<8xf32>
    %44 = vector.shape_cast %43 : vector<8xf32> to vector<8x1xf32>
    %cst_25 = arith.constant 1.562500e-02 : f32
    %45 = vector.broadcast %cst_25 : f32 to vector<8x1xf32>
    %46 = arith.mulf %44, %45 : vector<8x1xf32>
    %47 = arith.mulf %42, %42 : vector<8x128xf32>
    %cst_26 = arith.constant dense<0.000000e+00> : vector<8xf32>
    %48 = vector.multi_reduction <add>, %47, %cst_26 [1] : vector<8x128xf32> to vector<8xf32>
    %49 = vector.shape_cast %48 : vector<8xf32> to vector<8x1xf32>
    %cst_27 = arith.constant 1.562500e-02 : f32
    %50 = vector.broadcast %cst_27 : f32 to vector<8x1xf32>
    %51 = arith.mulf %49, %50 : vector<8x1xf32>
    %52 = arith.mulf %46, %46 : vector<8x1xf32>
    %53 = arith.subf %51, %52 : vector<8x1xf32>
    %54 = vector.broadcast %46 : vector<8x1xf32> to vector<8x128xf32>
    %55 = arith.subf %42, %54 : vector<8x128xf32>
    %cst_28 = arith.constant 9.99999974E-6 : f32
    %56 = vector.broadcast %cst_28 : f32 to vector<8x1xf32>
    %57 = arith.addf %53, %56 : vector<8x1xf32>
    %58 = math.rsqrt %57 : vector<8x1xf32>
    %59 = vector.broadcast %58 : vector<8x1xf32> to vector<8x128xf32>
    %60 = arith.mulf %55, %59 : vector<8x128xf32>
    %c1_29 = arith.constant 1 : index
    %c1_30 = arith.constant 1 : index
    %c0_31 = arith.constant 0 : index
    %61 = vector.load %arg3[%c1_29, %c1_30, %c0_31] : memref<4x3x128xf32, #tpu.memory_space<vmem>>, vector<1x1x128xf32>
    %62 = vector.shape_cast %61 : vector<1x1x128xf32> to vector<1x128xf32>
    %63 = vector.broadcast %62 : vector<1x128xf32> to vector<8x128xf32>
    %64 = arith.mulf %60, %63 : vector<8x128xf32>
    %c1_32 = arith.constant 1 : index
    %c2_33 = arith.constant 2 : index
    %c0_34 = arith.constant 0 : index
    %65 = vector.load %arg3[%c1_32, %c2_33, %c0_34] : memref<4x3x128xf32, #tpu.memory_space<vmem>>, vector<1x1x128xf32>
    %66 = vector.shape_cast %65 : vector<1x1x128xf32> to vector<1x128xf32>
    %67 = vector.broadcast %66 : vector<1x128xf32> to vector<8x128xf32>
    %68 = arith.addf %64, %67 : vector<8x128xf32>
    %cst_35 = arith.constant 0.000000e+00 : f32
    %69 = vector.broadcast %cst_35 : f32 to vector<8x128xf32>
    %70 = arith.maximumf %68, %69 : vector<8x128xf32>
    %c2_36 = arith.constant 2 : index
    %c0_37 = arith.constant 0 : index
    %c0_38 = arith.constant 0 : index
    %71 = vector.load %arg2[%c2_36, %c0_37, %c0_38] : memref<4x128x128xf32, #tpu.memory_space<vmem>>, vector<1x128x128xf32>
    %72 = vector.shape_cast %71 : vector<1x128x128xf32> to vector<128x128xf32>
    %cst_39 = arith.constant dense<0.000000e+00> : vector<8x128xf32>
    %73 = tpu.matmul %70, %72, %cst_39 {dimension_numbers = #tpu.dot_dimension_numbers<[1], [0], [0], [1], [0, 0, 1, 1], [], []>} : vector<8x128xf32>, vector<128x128xf32>, vector<8x128xf32> -> vector<8x128xf32>
    %c2_40 = arith.constant 2 : index
    %c0_41 = arith.constant 0 : index
    %c0_42 = arith.constant 0 : index
    %74 = vector.load %arg3[%c2_40, %c0_41, %c0_42] : memref<4x3x128xf32, #tpu.memory_space<vmem>>, vector<1x1x128xf32>
    %75 = vector.shape_cast %74 : vector<1x1x128xf32> to vector<1x128xf32>
    %76 = vector.broadcast %75 : vector<1x128xf32> to vector<8x128xf32>
    %77 = arith.addf %73, %76 : vector<8x128xf32>
    %cst_43 = arith.constant dense<0.000000e+00> : vector<8xf32>
    %78 = vector.multi_reduction <add>, %77, %cst_43 [1] : vector<8x128xf32> to vector<8xf32>
    %79 = vector.shape_cast %78 : vector<8xf32> to vector<8x1xf32>
    %cst_44 = arith.constant 3.125000e-02 : f32
    %80 = vector.broadcast %cst_44 : f32 to vector<8x1xf32>
    %81 = arith.mulf %79, %80 : vector<8x1xf32>
    %82 = arith.mulf %77, %77 : vector<8x128xf32>
    %cst_45 = arith.constant dense<0.000000e+00> : vector<8xf32>
    %83 = vector.multi_reduction <add>, %82, %cst_45 [1] : vector<8x128xf32> to vector<8xf32>
    %84 = vector.shape_cast %83 : vector<8xf32> to vector<8x1xf32>
    %cst_46 = arith.constant 3.125000e-02 : f32
    %85 = vector.broadcast %cst_46 : f32 to vector<8x1xf32>
    %86 = arith.mulf %84, %85 : vector<8x1xf32>
    %87 = arith.mulf %81, %81 : vector<8x1xf32>
    %88 = arith.subf %86, %87 : vector<8x1xf32>
    %89 = vector.broadcast %81 : vector<8x1xf32> to vector<8x128xf32>
    %90 = arith.subf %77, %89 : vector<8x128xf32>
    %cst_47 = arith.constant 9.99999974E-6 : f32
    %91 = vector.broadcast %cst_47 : f32 to vector<8x1xf32>
    %92 = arith.addf %88, %91 : vector<8x1xf32>
    %93 = math.rsqrt %92 : vector<8x1xf32>
    %94 = vector.broadcast %93 : vector<8x1xf32> to vector<8x128xf32>
    %95 = arith.mulf %90, %94 : vector<8x128xf32>
    %c2_48 = arith.constant 2 : index
    %c1_49 = arith.constant 1 : index
    %c0_50 = arith.constant 0 : index
    %96 = vector.load %arg3[%c2_48, %c1_49, %c0_50] : memref<4x3x128xf32, #tpu.memory_space<vmem>>, vector<1x1x128xf32>
    %97 = vector.shape_cast %96 : vector<1x1x128xf32> to vector<1x128xf32>
    %98 = vector.broadcast %97 : vector<1x128xf32> to vector<8x128xf32>
    %99 = arith.mulf %95, %98 : vector<8x128xf32>
    %c2_51 = arith.constant 2 : index
    %c2_52 = arith.constant 2 : index
    %c0_53 = arith.constant 0 : index
    %100 = vector.load %arg3[%c2_51, %c2_52, %c0_53] : memref<4x3x128xf32, #tpu.memory_space<vmem>>, vector<1x1x128xf32>
    %101 = vector.shape_cast %100 : vector<1x1x128xf32> to vector<1x128xf32>
    %102 = vector.broadcast %101 : vector<1x128xf32> to vector<8x128xf32>
    %103 = arith.addf %99, %102 : vector<8x128xf32>
    %cst_54 = arith.constant 0.000000e+00 : f32
    %104 = vector.broadcast %cst_54 : f32 to vector<8x128xf32>
    %105 = arith.maximumf %103, %104 : vector<8x128xf32>
    %c3 = arith.constant 3 : index
    %c0_55 = arith.constant 0 : index
    %c0_56 = arith.constant 0 : index
    %106 = vector.load %arg2[%c3, %c0_55, %c0_56] : memref<4x128x128xf32, #tpu.memory_space<vmem>>, vector<1x128x128xf32>
    %107 = vector.shape_cast %106 : vector<1x128x128xf32> to vector<128x128xf32>
    %cst_57 = arith.constant dense<0.000000e+00> : vector<8x128xf32>
    %108 = tpu.matmul %105, %107, %cst_57 {dimension_numbers = #tpu.dot_dimension_numbers<[1], [0], [0], [1], [0, 0, 1, 1], [], []>} : vector<8x128xf32>, vector<128x128xf32>, vector<8x128xf32> -> vector<8x128xf32>
    %c3_58 = arith.constant 3 : index
    %c0_59 = arith.constant 0 : index
    %c0_60 = arith.constant 0 : index
    %109 = vector.load %arg3[%c3_58, %c0_59, %c0_60] : memref<4x3x128xf32, #tpu.memory_space<vmem>>, vector<1x1x128xf32>
    %110 = vector.shape_cast %109 : vector<1x1x128xf32> to vector<1x128xf32>
    %111 = vector.broadcast %110 : vector<1x128xf32> to vector<8x128xf32>
    %112 = arith.addf %108, %111 : vector<8x128xf32>
    %113 = vector.extract_strided_slice %112 {offsets = [0, 0], sizes = [8, 1], strides = [1, 1]} : vector<8x128xf32> to vector<8x1xf32>
    %c0_61 = arith.constant 0 : index
    %c0_62 = arith.constant 0 : index
    %114 = vector.load %arg4[%c0_61, %c0_62] : memref<8x1xf32, #tpu.memory_space<vmem>>, vector<8x1xf32>
    tpu.vector_store %arg4[%c0_61, %c0_62], %113 {strides = array<i32>} : memref<8x1xf32, #tpu.memory_space<vmem>>, vector<8x1xf32>,
    return
  }
  func.func @transform_0(%arg0: i32) -> (i32, i32) {
    %c0_i32 = arith.constant 0 : i32
    %c0_i32_0 = arith.constant 0 : i32
    return %arg0, %c0_i32 : i32, i32
  }
  func.func @transform_1(%arg0: i32) -> (i32, i32, i32) {
    %c0_i32 = arith.constant 0 : i32
    %c0_i32_0 = arith.constant 0 : i32
    %c0_i32_1 = arith.constant 0 : i32
    %c0_i32_2 = arith.constant 0 : i32
    return %c0_i32, %c0_i32_0, %c0_i32_1 : i32, i32, i32
  }
  func.func @transform_2(%arg0: i32) -> (i32, i32, i32) {
    %c0_i32 = arith.constant 0 : i32
    %c0_i32_0 = arith.constant 0 : i32
    %c0_i32_1 = arith.constant 0 : i32
    %c0_i32_2 = arith.constant 0 : i32
    return %c0_i32, %c0_i32_0, %c0_i32_1 : i32, i32, i32
  }
  func.func @transform_3(%arg0: i32) -> (i32, i32) {
    %c0_i32 = arith.constant 0 : i32
    %c0_i32_0 = arith.constant 0 : i32
    return %arg0, %c0_i32 : i32, i32
  }
}

</mosaic_0001>

<bundles_post_ra>
// kernel: tpu_custom_call.1
= control target key start
LH: loop header
LB: loop body
LE: loop exit
PB: predicated region body
PF: predicated region fallthrough
CT: control target
= control target key end

     0   :  { %8 = vsyncpa [#allocation3], 0  ;;  %s699_s12 = smov [#allocation2]   ;;  %s835_s0 = inlined_call_operand.vmem [shape: f32[8,32], index: 0, kind: input, shape index: {}]   ;;  %s836_s1 = inlined_call_operand.hbm [shape: f32[4,128,128], index: 1, kind: input, shape index: {}]   ;;  %s837_s2 = inlined_call_operand.vmem [shape: f32[4,3,128], index: 2, kind: input, shape index: {}]   ;;  %s838_s3 = inlined_call_operand.vmem [shape: f32[8,1], index: 3, kind: output, shape index: {}]  }
   0x1   :  { %s16_s13 = sshll.u32 %s699_s12, 4  ;;  %s17_s13 = int_to_ptr.vmem [resolvable:$true] %s16_s13 }
   0x2   :  { %s685_s14 = scalar_lea.vmem %s17_s13, 8192  ;;  %p690_p1 = scmp.lt.s32.totalorder %s17_s13, %s17_s13 }
   0x3   :  { %p686_p0 = scmp.ne.s32.totalorder %s17_s13, %s685_s14  ;;  %p691_p2 = scmp.lt.s32.totalorder %s685_s14, %s685_s14 }
   0x5   :  { %p692_p3 = por %p691_p2, %p690_p1 }
   0x7   :  { %p693_p4 = pnand %p692_p3, %p686_p0 }
   0x9   :  { %696 = shalt.err (!%p693_p4)
}
   0xa   :  { %s700_s15 = smov 128   ;;  %s701_s16 = smov 8  }
   0xb   :  { %22 = dma.hbm_to_vmem [thread:$0]  %s836_s1, 8192, %s17_s13, [#allocation3], %s700_s15, %s700_s15, %s701_s16  }
   0xc   :  { %697 = dma.done.wait [#allocation3], 8192  }
   0xd   :  { %698 = vsyncadd [#allocation3], 4294959104  ;;  %v702_v0 = vmov 0.0   ;;  %vm703_vm0 = vmmov 0   ;;  %v32_v1 = vld [vmem:[#allocation2 + $0x18] sm:$0xff]  ;;  %v31_v2 = vld [vmem:[#allocation2 + $0x10] sm:$0xff] }
   0xe   :  { %550 = vmatprep.subr.mxu0 %v702_v0  ;;  %558 = vmatprep.mubr.msk.f32.mxu0 %vm703_vm0, %v702_v0  ;;  %v30_v3 = vld [vmem:[#allocation2 + $0x8] sm:$0xff]  ;;  %v29_v4 = vld [vmem:[#allocation2] sm:$0xff]  ;;  %vm38_vm1 = vcmask 261120   ;;  %v154_v11 = vld [vmem:[#allocation2 + $0xf8] sm:$0xff]  ;;  %vm469_vm2 = vcmask 7168  }
   0xf   :  { %561 = vmatprep.subr.mxu1 %v702_v0  ;;  %593 = vmatprep.mubr.msk.f32.mxu1 %vm703_vm0, %v702_v0  ;;  %v28_v5 = vld [vmem:[%s835_s0] sm:$0xff]  ;;  %v153_v12 = vld [vmem:[#allocation2 + $0xf0] sm:$0xff]  ;;  %v152_v13 = vld [vmem:[#allocation2 + $0xe8] sm:$0xff] }
  0x10   :  { %551 = vmatpush3.msra.mxu0 %v32_v1  ;;  %v476_v6 = vld [vmem:[%s837_s2] ss:$0 sm:$0xff]  ;;  %562 = vmatpush3.msra.mxu1 %v154_v11  ;;  %v150_v15 = vld [vmem:[#allocation2 + $0xd8] sm:$0xff]  ;;  %v149_v16 = vld [vmem:[#allocation2 + $0xd0] sm:$0xff] }
  0x11   :  { %552 = vmatprep.subr.mxu0 %v702_v0  ;;  %563 = vmatprep.subr.mxu1 %v702_v0  ;;  %v151_v14 = vld [vmem:[#allocation2 + $0xe0] sm:$0xff]  ;;  %v148_v17 = vld [vmem:[#allocation2 + $0xc8] sm:$0xff]  ;;  %v146_v19 = vld [vmem:[#allocation2 + $0xb8] sm:$0xff] }
  0x12   :  { %553 = vmatpush3.msra.mxu0 %v31_v2  ;;  %564 = vmatpush3.msra.mxu1 %v153_v12  ;;  %v147_v18 = vld [vmem:[#allocation2 + $0xc0] sm:$0xff]  ;;  %v145_v20 = vld [vmem:[#allocation2 + $0xb0] sm:$0xff]  ;;  %v144_v21 = vld [vmem:[#allocation2 + $0xa8] sm:$0xff] }
  0x13   :  { %554 = vmatprep.subr.mxu0 %v702_v0  ;;  %565 = vmatprep.subr.mxu1 %v702_v0  ;;  %v143_v22 = vld [vmem:[#allocation2 + $0xa0] sm:$0xff]  ;;  %v142_v23 = vld [vmem:[#allocation2 + $0x98] sm:$0xff]  ;;  %v141_v24 = vld [vmem:[#allocation2 + $0x90] sm:$0xff] }
  0x14   :  { %555 = vmatpush3.msra.mxu0 %v30_v3  ;;  %566 = vmatpush3.msra.mxu1 %v152_v13  ;;  %v140_v25 = vld [vmem:[#allocation2 + $0x88] sm:$0xff]  ;;  %v139_v26 = vld [vmem:[#allocation2 + $0x80] sm:$0xff]  ;;  %v273_v47 = vld [vmem:[#allocation2 + $0x178] sm:$0xff] }
  0x15   :  { %556 = vmatprep.subr.mxu0 %v702_v0  ;;  %567 = vmatprep.subr.mxu1 %v702_v0  ;;  %v478_v36 = vld [vmem:[%s837_s2 + $0x1] ss:$0 sm:$0xff]  ;;  %v479_v38 = vld [vmem:[%s837_s2 + $0x2] ss:$0 sm:$0xff]  ;;  %v481_v42 = vld [vmem:[%s837_s2 + $0x4] ss:$0 sm:$0xff] }
  0x16   :  { %557 = vmatpush3.msra.mxu0 %v29_v4  ;;  %568 = vmatpush3.msra.mxu1 %v151_v14  ;;  %v272_v48 = vld [vmem:[#allocation2 + $0x170] sm:$0xff]  ;;  %v271_v49 = vld [vmem:[#allocation2 + $0x168] sm:$0xff]  ;;  %v270_v50 = vld [vmem:[#allocation2 + $0x160] sm:$0xff] }
  0x17   :  { %559 = vmatmul.mubr.msk.f32.vlgmr.msra.gmra.mxu0 %vm38_vm1, %v28_v5  ;;  %596 = vmatprep.subr.mxu0 %v702_v0  ;;  %v269_v51 = vld [vmem:[#allocation2 + $0x158] sm:$0xff]  ;;  %v268_v52 = vld [vmem:[#allocation2 + $0x150] sm:$0xff]  ;;  %v267_v53 = vld [vmem:[#allocation2 + $0x148] sm:$0xff] }
  0x18   :  { %628 = vmatprep.mubr.msk.f32.mxu0 %vm703_vm0, %v702_v0  ;;  %569 = vmatprep.subr.mxu1 %v702_v0  ;;  %v266_v54 = vld [vmem:[#allocation2 + $0x140] sm:$0xff]  ;;  %v265_v55 = vld [vmem:[#allocation2 + $0x138] sm:$0xff]  ;;  %v264_v56 = vld [vmem:[#allocation2 + $0x130] sm:$0xff] }
  0x19   :  { %570 = vmatpush3.msra.mxu1 %v150_v15  ;;  %597 = vmatpush3.msra.mxu0 %v273_v47  ;;  %v263_v57 = vld [vmem:[#allocation2 + $0x128] sm:$0xff]  ;;  %v262_v58 = vld [vmem:[#allocation2 + $0x120] sm:$0xff]  ;;  %v261_v59 = vld [vmem:[#allocation2 + $0x118] sm:$0xff] }
  0x1a   :  { %571 = vmatprep.subr.mxu1 %v702_v0  ;;  %598 = vmatprep.subr.mxu0 %v702_v0  ;;  %v260_v60 = vld [vmem:[#allocation2 + $0x110] sm:$0xff]  ;;  %v259_v61 = vld [vmem:[#allocation2 + $0x108] sm:$0xff]  ;;  %v258_v62 = vld [vmem:[#allocation2 + $0x100] sm:$0xff] }
  0x1b   :  { %572 = vmatpush3.msra.mxu1 %v149_v16  ;;  %599 = vmatpush3.msra.mxu0 %v272_v48  ;;  %v485_v11 = vld [vmem:[%s837_s2 + $0x6] ss:$0 sm:$0xff]  ;;  %v392_v15 = vld [vmem:[#allocation2 + $0x1f8] sm:$0xff]  ;;  %v487_v16 = vld [vmem:[%s837_s2 + $0x8] ss:$0 sm:$0xff] }
  0x1c   :  { %573 = vmatprep.subr.mxu1 %v702_v0  ;;  %600 = vmatprep.subr.mxu0 %v702_v0 }
  0x1d   :  { %574 = vmatpush3.msra.mxu1 %v148_v17  ;;  %601 = vmatpush3.msra.mxu0 %v271_v49 }
  0x1e   :  { %575 = vmatprep.subr.mxu1 %v702_v0  ;;  %602 = vmatprep.subr.mxu0 %v702_v0 }
  0x1f   :  { %576 = vmatpush3.msra.mxu1 %v147_v18  ;;  %603 = vmatpush3.msra.mxu0 %v270_v50  ;;  %v493_v50 = vld [vmem:[%s837_s2 + $0xc] ss:$0 sm:$0xff] }
  0x20   :  { %577 = vmatprep.subr.mxu1 %v702_v0  ;;  %604 = vmatprep.subr.mxu0 %v702_v0 }
  0x21   :  { %578 = vmatpush3.msra.mxu1 %v146_v19  ;;  %605 = vmatpush3.msra.mxu0 %v269_v51 }
  0x22   :  { %579 = vmatprep.subr.mxu1 %v702_v0  ;;  %606 = vmatprep.subr.mxu0 %v702_v0 }
  0x23   :  { %580 = vmatpush3.msra.mxu1 %v145_v20  ;;  %607 = vmatpush3.msra.mxu0 %v268_v52 }
  0x24   :  { %581 = vmatprep.subr.mxu1 %v702_v0  ;;  %608 = vmatprep.subr.mxu0 %v702_v0 }
  0x25   :  { %582 = vmatpush3.msra.mxu1 %v144_v21  ;;  %609 = vmatpush3.msra.mxu0 %v267_v53  ;;  %v391_v21 = vld [vmem:[#allocation2 + $0x1f0] sm:$0xff] }
  0x26   :  { %583 = vmatprep.subr.mxu1 %v702_v0  ;;  %610 = vmatprep.subr.mxu0 %v702_v0 }
  0x27   :  { %584 = vmatpush3.msra.mxu1 %v143_v22  ;;  %611 = vmatpush3.msra.mxu0 %v266_v54  ;;  %v390_v22 = vld [vmem:[#allocation2 + $0x1e8] sm:$0xff] }
  0x28   :  { %585 = vmatprep.subr.mxu1 %v702_v0  ;;  %612 = vmatprep.subr.mxu0 %v702_v0 }
  0x29   :  { %586 = vmatpush3.msra.mxu1 %v142_v23  ;;  %613 = vmatpush3.msra.mxu0 %v265_v55  ;;  %v389_v23 = vld [vmem:[#allocation2 + $0x1e0] sm:$0xff] }
  0x2a   :  { %587 = vmatprep.subr.mxu1 %v702_v0  ;;  %614 = vmatprep.subr.mxu0 %v702_v0 }
  0x2b   :  { %588 = vmatpush3.msra.mxu1 %v141_v24  ;;  %615 = vmatpush3.msra.mxu0 %v264_v56  ;;  %v388_v24 = vld [vmem:[#allocation2 + $0x1d8] sm:$0xff] }
  0x2c   :  { %589 = vmatprep.subr.mxu1 %v702_v0  ;;  %616 = vmatprep.subr.mxu0 %v702_v0 }
  0x2d   :  { %590 = vmatpush3.msra.mxu1 %v140_v25  ;;  %617 = vmatpush3.msra.mxu0 %v263_v57  ;;  %v387_v25 = vld [vmem:[#allocation2 + $0x1d0] sm:$0xff] }
  0x2e   :  { %591 = vmatprep.subr.mxu1 %v702_v0  ;;  %618 = vmatprep.subr.mxu0 %v702_v0 }
  0x2f   :  { %592 = vmatpush3.msra.mxu1 %v139_v26  ;;  %619 = vmatpush3.msra.mxu0 %v262_v58  ;;  %v386_v26 = vld [vmem:[#allocation2 + $0x1c8] sm:$0xff] }
  0x30   :  { %631 = vmatprep.subr.mxu1 %v702_v0  ;;  %620 = vmatprep.subr.mxu0 %v702_v0 }
  0x31   :  { %621 = vmatpush3.msra.mxu0 %v261_v59 }
  0x32   :  { %622 = vmatprep.subr.mxu0 %v702_v0 }
  0x33   :  { %623 = vmatpush3.msra.mxu0 %v260_v60 }
  0x34   :  { %624 = vmatprep.subr.mxu0 %v702_v0 }
  0x35   :  { %625 = vmatpush3.msra.mxu0 %v259_v61 }
  0x36   :  { %626 = vmatprep.subr.mxu0 %v702_v0 }
  0x37   :  { %627 = vmatpush3.msra.mxu0 %v258_v62 }
  0xd7   :  { %v108_v7 = vpop.f32.mrf.mxu0 }
  0xd8   :  { %v745_v8 = vadd.f32 %v476_v6, %v108_v7 }
  0xd9   :  { %v560_v9 = vpop.f32.mrf.mxu0 }
  0xda   :  { %112 = vadd.xlane.f32.xlu0 %v745_v8  ;;  %v115_v10 = vmul.f32 %v745_v8, %v745_v8  ;;  %v483_v9 = vld [vmem:[%s837_s2 + $0x5] ss:$0 sm:$0xff] }
  0xde   :  { %116 = vadd.xlane.f32.xlu0 %v115_v10 }
 0x163   :  { %v113_v27 = vpop.xlane.xlu0 %112 }
 0x164   :  { %v114_v28 = vmul.f32 0.03125, %v113_v27  ;;  %v385_v27 = vld [vmem:[#allocation2 + $0x1c0] sm:$0xff] }
 0x166   :  { %v119_v30 = vmul.f32 %v114_v28, %v114_v28  ;;  %v121_v34 = vsub.f32 %v745_v8, %v114_v28  ;;  %v384_v28 = vld [vmem:[#allocation2 + $0x1b8] sm:$0xff] }
 0x167   :  { %v117_v29 = vpop.xlane.xlu0 %116 }
 0x168   :  { %v118_v31 = vmul.f32 0.03125, %v117_v29  ;;  %v383_v29 = vld [vmem:[#allocation2 + $0x1b0] sm:$0xff] }
 0x16a   :  { %v120_v32 = vsub.f32 %v118_v31, %v119_v30  ;;  %v382_v30 = vld [vmem:[#allocation2 + $0x1a8] sm:$0xff]  ;;  %v381_v31 = vld [vmem:[#allocation2 + $0x1a0] sm:$0xff] }
 0x16c   :  { %v122_v33 = vadd.f32 1e-05, %v120_v32  ;;  %v380_v32 = vld [vmem:[#allocation2 + $0x198] sm:$0xff] }
 0x16e   :  { %671 = vrsqrt.f32 %v122_v33  ;;  %v379_v33 = vld [vmem:[#allocation2 + $0x190] sm:$0xff] }
 0x17b   :  { %v672_v35 = vpop.eup %671 }
 0x17c   :  { %v124_v37 = vmul.f32 %v672_v35, %v121_v34  ;;  %v378_v34 = vld [vmem:[#allocation2 + $0x188] sm:$0xff]  ;;  %v377_v35 = vld [vmem:[#allocation2 + $0x180] sm:$0xff] }
 0x17e   :  { %v130_v39 = vmul.f32 %v478_v36, %v124_v37 }
 0x180   :  { %v136_v40 = vadd.f32 %v479_v38, %v130_v39 }
 0x182   :  { %v137_v41 = vmax.f32 %v136_v40, 0.0 }
 0x184   :  { %594 = vmatmul.mubr.f32.vlgmr.msra.gmra.mxu1 %v137_v41 }
 0x185   :  { %663 = vmatprep.mubr.msk.f32.mxu1 %vm703_vm0, %v702_v0  ;;  %632 = vmatpush3.msra.mxu1 %v392_v15 }
 0x186   :  { %633 = vmatprep.subr.mxu1 %v702_v0 }
 0x187   :  { %634 = vmatpush3.msra.mxu1 %v391_v21 }
 0x188   :  { %635 = vmatprep.subr.mxu1 %v702_v0 }
 0x189   :  { %636 = vmatpush3.msra.mxu1 %v390_v22 }
 0x18a   :  { %637 = vmatprep.subr.mxu1 %v702_v0 }
 0x18b   :  { %638 = vmatpush3.msra.mxu1 %v389_v23 }
 0x18c   :  { %639 = vmatprep.subr.mxu1 %v702_v0 }
 0x18d   :  { %640 = vmatpush3.msra.mxu1 %v388_v24 }
 0x18e   :  { %641 = vmatprep.subr.mxu1 %v702_v0 }
 0x18f   :  { %642 = vmatpush3.msra.mxu1 %v387_v25 }
 0x190   :  { %643 = vmatprep.subr.mxu1 %v702_v0 }
 0x191   :  { %644 = vmatpush3.msra.mxu1 %v386_v26 }
 0x192   :  { %645 = vmatprep.subr.mxu1 %v702_v0 }
 0x193   :  { %646 = vmatpush3.msra.mxu1 %v385_v27 }
 0x194   :  { %647 = vmatprep.subr.mxu1 %v702_v0 }
 0x195   :  { %648 = vmatpush3.msra.mxu1 %v384_v28 }
 0x196   :  { %649 = vmatprep.subr.mxu1 %v702_v0 }
 0x197   :  { %650 = vmatpush3.msra.mxu1 %v383_v29 }
 0x198   :  { %651 = vmatprep.subr.mxu1 %v702_v0 }
 0x199   :  { %652 = vmatpush3.msra.mxu1 %v382_v30 }
 0x19a   :  { %653 = vmatprep.subr.mxu1 %v702_v0 }
 0x19b   :  { %654 = vmatpush3.msra.mxu1 %v381_v31 }
 0x19c   :  { %655 = vmatprep.subr.mxu1 %v702_v0 }
 0x19d   :  { %656 = vmatpush3.msra.mxu1 %v380_v32 }
 0x19e   :  { %657 = vmatprep.subr.mxu1 %v702_v0 }
 0x19f   :  { %658 = vmatpush3.msra.mxu1 %v379_v33 }
 0x1a0   :  { %659 = vmatprep.subr.mxu1 %v702_v0 }
 0x1a1   :  { %660 = vmatpush3.msra.mxu1 %v378_v34 }
 0x1a2   :  { %661 = vmatprep.subr.mxu1 %v702_v0  ;;  %v491_v0 = vld [vmem:[%s837_s2 + $0xa] ss:$0 sm:$0xff] }
 0x1a3   :  { %662 = vmatpush3.msra.mxu1 %v377_v35 }
 0x244   :  { %v227_v43 = vpop.f32.mrf.mxu1 }
 0x245   :  { %v778_v44 = vadd.f32 %v481_v42, %v227_v43 }
 0x246   :  { %v595_v45 = vpop.f32.mrf.mxu1 }
 0x247   :  { %231 = vadd.xlane.f32.xlu1 %v778_v44  ;;  %v234_v46 = vmul.f32 %v778_v44, %v778_v44  ;;  %v489_v45 = vld [vmem:[%s837_s2 + $0x9] ss:$0 sm:$0xff] }
 0x24b   :  { %235 = vadd.xlane.f32.xlu1 %v234_v46 }
 0x2d0   :  { %v232_v63 = vpop.xlane.xlu1 %231 }
 0x2d1   :  { %v233_v1 = vmul.f32 0.015625, %v232_v63 }
 0x2d3   :  { %v238_v3 = vmul.f32 %v233_v1, %v233_v1  ;;  %v240_v7 = vsub.f32 %v778_v44, %v233_v1 }
 0x2d4   :  { %v236_v2 = vpop.xlane.xlu1 %235 }
 0x2d5   :  { %v237_v4 = vmul.f32 0.015625, %v236_v2 }
 0x2d7   :  { %v239_v5 = vsub.f32 %v237_v4, %v238_v3 }
 0x2d9   :  { %v241_v6 = vadd.f32 1e-05, %v239_v5 }
 0x2db   :  { %673 = vrsqrt.f32 %v241_v6 }
 0x2e8   :  { %v674_v8 = vpop.eup %673 }
 0x2e9   :  { %v243_v10 = vmul.f32 %v674_v8, %v240_v7 }
 0x2eb   :  { %v249_v12 = vmul.f32 %v483_v9, %v243_v10 }
 0x2ed   :  { %v255_v13 = vadd.f32 %v485_v11, %v249_v12 }
 0x2ef   :  { %v256_v14 = vmax.f32 %v255_v13, 0.0 }
 0x2f1   :  { %629 = vmatmul.mubr.f32.vlgmr.msra.gmra.mxu0 %v256_v14 }
 0x3b1   :  { %v346_v17 = vpop.f32.mrf.mxu0 }
 0x3b2   :  { %v347_v18 = vadd.f32 %v487_v16, %v346_v17 }
 0x3b3   :  { %v630_v19 = vpop.f32.mrf.mxu0 }
 0x3b4   :  { %350 = vadd.xlane.f32.xlu0 %v347_v18  ;;  %v353_v20 = vmul.f32 %v347_v18, %v347_v18 }
 0x3b6   :  { %354 = vadd.xlane.f32.xlu1 %v353_v20 }
 0x43d   :  { %v351_v36 = vpop.xlane.xlu0 %350 }
 0x43e   :  { %v352_v37 = vmul.f32 0.03125, %v351_v36 }
 0x43f   :  { %v355_v38 = vpop.xlane.xlu1 %354 }
 0x440   :  { %v357_v39 = vmul.f32 %v352_v37, %v352_v37  ;;  %v356_v40 = vmul.f32 0.03125, %v355_v38  ;;  %v359_v43 = vsub.f32 %v347_v18, %v352_v37 }
 0x442   :  { %v358_v41 = vsub.f32 %v356_v40, %v357_v39 }
 0x444   :  { %v360_v42 = vadd.f32 1e-05, %v358_v41 }
 0x446   :  { %675 = vrsqrt.f32 %v360_v42 }
 0x453   :  { %v676_v44 = vpop.eup %675 }
 0x454   :  { %v362_v46 = vmul.f32 %v676_v44, %v359_v43 }
 0x456   :  { %v368_v47 = vmul.f32 %v489_v45, %v362_v46 }
 0x458   :  { %v374_v48 = vadd.f32 %v491_v0, %v368_v47 }
 0x45a   :  { %v375_v49 = vmax.f32 %v374_v48, 0.0 }
 0x45c   :  { %664 = vmatmul.mubr.f32.vlgmr.msra.gmra.mxu1 %v375_v49 }
 0x51c   :  { %v465_v51 = vpop.f32.mrf.mxu1 }
 0x51d   :  { %v466_v52 = vadd.f32 %v493_v50, %v465_v51 }
 0x51e   :  { %v665_v53 = vpop.f32.mrf.mxu1 }
 0x51f   :  { %470 = vst.msk [vmem:[%s838_s3] sm:$0xff] %vm469_vm2, %v466_v52 }
 0x520   :  { %475 = vsyncpa [#allocation3], 1 }

</bundles_post_ra>
